<compile_context>
chip_gen: v7x
topology: tpu7x:2x2x1
jax: 0.10.0
libtpu: 0.0.40
codegen_flags: <defaults>
</compile_context>

<pallas_src>
import math
import functools

import jax
import jax.numpy as jnp
from jax.experimental import pallas as pl
from jax.experimental.pallas import tpu as pltpu


_VMEM = pl.BlockSpec(memory_space=pltpu.MemorySpace.VMEM)


# ----------------------------------------------------------------------------
# Parameter construction mirroring creak_layer_mask (glue, plain Python / JAX)
# ----------------------------------------------------------------------------
def calculate_mask_index(kernel_length_now, largest_kernel_length):
    right = math.ceil((largest_kernel_length - 1) / 2) - math.ceil((kernel_length_now - 1) / 2)
    left = largest_kernel_length - kernel_length_now - right
    return left, left + kernel_length_now


def _ceil_to(x, m):
    return -(-x // m) * m


def init_os_layer_params(key, layer_parameters, matmul_dtype=jnp.float32):
    """Masked 'big' conv weights exactly like creak_layer_mask (PyTorch fan_in uniform
    init), stored per-tap as (K, Cin, Cout) for the K-accumulated in-kernel matmuls."""
    max_k = layer_parameters[-1][-1]
    cin = layer_parameters[0][0]
    w_list = []
    for (ci, co, k) in layer_parameters:
        key, kw, kb = jax.random.split(key, 3)
        bound = 1.0 / math.sqrt(ci * k)
        w = jax.random.uniform(kw, (co, ci, k), jnp.float32, -bound, bound)
        # Conv bias drawn (to mirror PyTorch init) but never used: with the
        # training-mode BatchNorm right after the conv, a per-channel bias is
        # exactly cancelled by the batch-mean subtraction.
        _unused_bias = jax.random.uniform(kb, (co,), jnp.float32, -bound, bound)
        il, ir = calculate_mask_index(k, max_k)
        big = jnp.zeros((co, ci, max_k), jnp.float32).at[:, :, il:ir].set(w)
        w_list.append(big)
    W = jnp.concatenate(w_list, axis=0)                         # (Cout, Cin, max_k), masked
    cout = W.shape[0]
    # per-tap weights: w_taps[j, ci, co] = W[co, ci, j]
    w_taps = jnp.transpose(W, (2, 1, 0)).astype(matmul_dtype)   # (K, Cin, Cout)
    gamma = jnp.ones((cout,), jnp.float32)                      # BatchNorm1d affine defaults
    beta = jnp.zeros((cout,), jnp.float32)
    gb = jnp.stack([gamma, beta], axis=0)                       # (2, Cout): one small input
    meta = (max_k, (max_k - 1) // 2, max_k // 2, cin, cout)     # (K, pad_l, pad_r, Cin, Cout)
    return key, dict(w=w_taps, gb=gb, meta=meta)


def init_os_cnn_params(key, layer_parameter_list, n_class, matmul_dtype=jnp.float32):
    layers = []
    for lp in layer_parameter_list:
        key, p = init_os_layer_params(key, lp, matmul_dtype)
        layers.append(p)
    c_final = layers[-1]["meta"][4]
    key, kw, kb = jax.random.split(key, 3)
    bound = 1.0 / math.sqrt(c_final)
    hidden_w = jax.random.uniform(kw, (n_class, c_final), jnp.float32, -bound, bound)
    hidden_b = jax.random.uniform(kb, (n_class,), jnp.float32, -bound, bound)
    return key, dict(layers=layers,
                     head_wt=jnp.transpose(hidden_w).astype(matmul_dtype),  # (C, n_class)
                     head_b=hidden_b[None, :],
                     n_class=n_class, c_final=c_final)


# ----------------------------------------------------------------------------
# The fused Pallas kernel
# ----------------------------------------------------------------------------
def _os_fused_kernel(*refs, metas, B, L, halo_l, mode):
    """All OS layers (+ optional pool/head) in one invocation.

    refs layout: [x_nlc, (w_taps, gb) per layer, (head_wt, head_b) if mode=='head',
                  out_ref, halo_buf (VMEM scratch)]
    mode: 'sequence' (single-layer module output), 'pool' (few_shot features),
          'head' (pooled features -> Linear logits).
    """
    out_ref, buf = refs[-2], refs[-1]       # buf: (B, L_halo, C_max), matmul dtype
    x_ref = refs[0]

    rows = B * L
    inv_n = 1.0 / rows
    # Hoisted MXU column-sum LHS (reused by every layer's BN statistics).
    ones_row = jnp.ones((1, rows), jnp.float32)

    # Zero the persistent halo/activation buffer once; all later padding is free.
    buf[...] = jnp.zeros(buf.shape, buf.dtype)
    cin0 = metas[0][3]
    buf[:, halo_l:halo_l + L, 0:cin0] = x_ref[...]

    idx = 1
    n_layers = len(metas)
    y = None
    for li, (K, pad_l, pad_r, cin, cout) in enumerate(metas):
        w_all = refs[idx][...]              # (K, Cin, Cout), matmul dtype
        gb = refs[idx + 1][...]             # (2, Cout), f32
        idx += 2

        # Masked Conv1d as K accumulated MXU matmuls over shifted windows of the
        # zero-halo buffer (no im2col concat, no per-layer pad copy).
        base = halo_l - pad_l
        acc = None
        for k in range(K):
            xk = buf[:, pl.ds(base + k, L), 0:cin].reshape(rows, cin)
            d = jnp.dot(xk, w_all[k], preferred_element_type=jnp.float32)
            acc = d if acc is None else acc + d                    # (rows, Cout) f32

        # Conv bias omitted (exactly cancelled by the training-mode BN below).
        # BatchNorm1d, training-mode biased batch stats over (N, L); column sums on
        # the MXU so the XLU stays free for the window shifts; rsqrt on the EUP.
        sum1 = jnp.dot(ones_row, acc, preferred_element_type=jnp.float32)        # (1, Cout)
        sum2 = jnp.dot(ones_row, acc * acc, preferred_element_type=jnp.float32)  # (1, Cout)
        mean = sum1 * inv_n
        var = sum2 * inv_n - mean * mean
        s = gb[0:1, :] * jax.lax.rsqrt(var + 1e-5)
        t = gb[1:2, :] - mean * s
        y = jnp.maximum(acc * s + t, 0.0)                          # ReLU, (rows, Cout) f32

        if li + 1 < n_layers:
            # Next layer's input: write back into the buffer centre (halo rows stay
            # zero, so the ConstantPad1d of the next layer is already done).
            buf[:, halo_l:halo_l + L, 0:cout] = y.reshape(B, L, cout).astype(buf.dtype)

    if mode == "sequence":
        res = y                                                    # (B*L, Cout) f32
    else:
        pooled = jnp.mean(y.reshape(B, L, -1), axis=1)             # AdaptiveAvgPool1d(1)
        if mode == "pool":
            res = pooled
        else:  # 'head'
            wt = refs[idx][...]
            hb = refs[idx + 1][...]
            res = jnp.dot(pooled.astype(wt.dtype), wt,
                          preferred_element_type=jnp.float32) + hb

    # Lane-dense, sublane-aligned output block: zero-init once, then store the valid
    # sub-slice directly (no zero-concat copies of the result).
    out_ref[...] = jnp.zeros(out_ref.shape, out_ref.dtype)
    r, c = res.shape
    out_ref[0:r, 0:c] = res


# ----------------------------------------------------------------------------
# JAX wrappers (layout plumbing only)
# ----------------------------------------------------------------------------
def _run_fused(x_nlc, layers, metas, mode, head=None):
    B, L, _ = x_nlc.shape
    mm_dtype = layers[0]["w"].dtype

    inputs = [x_nlc.astype(mm_dtype)]
    for p in layers:
        inputs += [p["w"], p["gb"]]
    if mode == "head":
        inputs += [head[0], head[1]]

    halo_l = max(m[1] for m in metas)
    halo_r = max(m[2] for m in metas)
    c_max = max(max(m[3], m[4]) for m in metas)
    l_halo = _ceil_to(halo_l + L + halo_r, 8)          # sublane-aligned halo buffer length

    c_last = metas[-1][4]
    if mode == "sequence":
        rows, cols = B * L, c_last
    elif mode == "pool":
        rows, cols = B, c_last
    else:
        rows, cols = B, head[0].shape[-1]
    rows_pad = _ceil_to(rows, 8)
    lanes_pad = _ceil_to(cols, 128)

    kernel = functools.partial(_os_fused_kernel, metas=tuple(metas),
                               B=B, L=L, halo_l=halo_l, mode=mode)
    out = pl.pallas_call(
        kernel,
        out_shape=jax.ShapeDtypeStruct((rows_pad, lanes_pad), jnp.float32),
        in_specs=[_VMEM] * len(inputs),
        out_specs=_VMEM,
        scratch_shapes=[pltpu.VMEM((B, l_halo, c_max), mm_dtype)],
    )(*inputs)
    return out[:rows, :cols]


def os_layer_forward(x_ncw, layer_params):
    """Single build_layer_with_layer_parameter forward: (N, Cin, L) -> (N, Cout, L)."""
    B, _, L = x_ncw.shape
    x = jnp.transpose(x_ncw, (0, 2, 1))                # NCW -> NLC (L=16 is 8-aligned,
    y = _run_fused(x, [layer_params], [layer_params["meta"]], "sequence")  # reshapes free)
    return jnp.transpose(y.reshape(B, L, -1), (0, 2, 1)).astype(jnp.float32)  # back to NCW


def os_cnn_forward(x_ncw, net, few_shot=True):
    """Full OS-CNN forward (all stages + pool [+ Linear head]) in one pallas_call."""
    x = jnp.transpose(x_ncw, (0, 2, 1))                # NCW -> NLC
    metas = [p["meta"] for p in net["layers"]]
    if few_shot:
        return _run_fused(x, net["layers"], metas, "pool")
    return _run_fused(x, net["layers"], metas, "head",
                      head=(net["head_wt"], net["head_b"]))


# ----------------------------------------------------------------------------
# Main
# ----------------------------------------------------------------------------
if __name__ == "__main__":
    key = jax.random.PRNGKey(0)

    # small OS-CNN configuration: (in_channels, out_channels, kernel_size) tuples
    layer_parameter_list = [
        [(4, 8, 1), (4, 8, 3), (4, 8, 5)],      # layer 1: Cin=4,  Cout=24, max_k=5
        [(24, 8, 1), (24, 8, 3), (24, 8, 5)],   # layer 2: Cin=24, Cout=24, max_k=5
        [(24, 8, 1), (24, 8, 3)],               # layer 3: Cin=24, Cout=16, max_k=3
    ]
    n_class = 5

    # bf16 MXU operands (native on v6e/v7x, halves weight/activation DMA + VMEM bytes);
    # BatchNorm/ReLU math stays f32 inside the kernel.  Use jnp.float32 here if exact
    # f32 conv fidelity is required (e.g. bit-matching a PyTorch reference on v5e).
    key, net = init_os_cnn_params(key, layer_parameter_list, n_class,
                                  matmul_dtype=jnp.bfloat16)

    # input: (batch=2, channels=4, length=16) — PyTorch Conv1d NCW convention
    key, kx = jax.random.split(key)
    x = jax.random.normal(kx, (2, 4, 16), jnp.float32)

    # single-layer module forward (the spec module): (2, 4, 16) -> (2, 24, 16)
    y1 = jax.block_until_ready(os_layer_forward(x, net["layers"][0]))
    assert y1.shape == (2, 24, 16) and y1.dtype == jnp.float32

    # full network, few_shot=False path (pool + Linear head inside the fused kernel)
    out = jax.block_until_ready(os_cnn_forward(x, net, few_shot=False))
    assert out.shape == (2, n_class) and out.dtype == jnp.float32

    # full network, few_shot=True path (module default): pooled features only
    feats = jax.block_until_ready(os_cnn_forward(x, net, few_shot=True))
    assert feats.shape == (2, net["c_final"])

    print("KERNEL_OK")
</pallas_src>

<mosaic_0001>
module attributes {stable_mosaic.version = 11 : i64} {
  func.func @_os_fused_kernel(%arg0: memref<2x16x4xbf16, #tpu.memory_space<vmem>>, %arg1: memref<5x4x24xbf16, #tpu.memory_space<vmem>>, %arg2: memref<2x24xf32, #tpu.memory_space<vmem>>, %arg3: memref<32x128xf32, #tpu.memory_space<vmem>>, %arg4: memref<2x24x24xbf16, #tpu.memory_space<vmem>>) attributes {dimension_semantics = [], scalar_prefetch = 0 : i64, scratch_operands = 1 : i64, tpu.core_type = #tpu.core_type<tc>} {
    %cst = arith.constant 1.000000e+00 : f32
    %0 = vector.broadcast %cst : f32 to vector<1x32xf32>
    %cst_0 = arith.constant 0.000000e+00 : bf16
    %1 = vector.broadcast %cst_0 : bf16 to vector<2x24x24xbf16>
    %c0 = arith.constant 0 : index
    %c0_1 = arith.constant 0 : index
    %c0_2 = arith.constant 0 : index
    %2 = vector.load %arg4[%c0, %c0_1, %c0_2] : memref<2x24x24xbf16, #tpu.memory_space<vmem>>, vector<2x24x24xbf16>
    tpu.vector_store %arg4[%c0, %c0_1, %c0_2], %1 {strides = array<i32>} : memref<2x24x24xbf16, #tpu.memory_space<vmem>>, vector<2x24x24xbf16>,
    %c0_3 = arith.constant 0 : index
    %c0_4 = arith.constant 0 : index
    %c0_5 = arith.constant 0 : index
    %3 = vector.load %arg0[%c0_3, %c0_4, %c0_5] : memref<2x16x4xbf16, #tpu.memory_space<vmem>>, vector<2x16x4xbf16>
    %c0_6 = arith.constant 0 : index
    %c2 = arith.constant 2 : index
    %c0_7 = arith.constant 0 : index
    %4 = vector.load %arg4[%c0_6, %c2, %c0_7] : memref<2x24x24xbf16, #tpu.memory_space<vmem>>, vector<2x16x4xbf16>
    tpu.vector_store %arg4[%c0_6, %c2, %c0_7], %3 {strides = array<i32>} : memref<2x24x24xbf16, #tpu.memory_space<vmem>>, vector<2x16x4xbf16>,
    %c0_8 = arith.constant 0 : index
    %c0_9 = arith.constant 0 : index
    %c0_10 = arith.constant 0 : index
    %5 = vector.load %arg1[%c0_8, %c0_9, %c0_10] : memref<5x4x24xbf16, #tpu.memory_space<vmem>>, vector<5x4x24xbf16>
    %c0_11 = arith.constant 0 : index
    %c0_12 = arith.constant 0 : index
    %6 = vector.load %arg2[%c0_11, %c0_12] : memref<2x24xf32, #tpu.memory_space<vmem>>, vector<2x24xf32>
    %c0_13 = arith.constant 0 : index
    %c0_14 = arith.constant 0 : index
    %c0_15 = arith.constant 0 : index
    %7 = vector.load %arg4[%c0_13, %c0_14, %c0_15] : memref<2x24x24xbf16, #tpu.memory_space<vmem>>, vector<2x16x4xbf16>
    %8 = vector.shape_cast %7 : vector<2x16x4xbf16> to vector<32x4xbf16>
    %9 = vector.extract_strided_slice %5 {offsets = [0, 0, 0], sizes = [1, 4, 24], strides = [1, 1, 1]} : vector<5x4x24xbf16> to vector<1x4x24xbf16>
    %10 = vector.shape_cast %9 : vector<1x4x24xbf16> to vector<4x24xbf16>
    %cst_16 = arith.constant dense<0.000000e+00> : vector<32x24xf32>
    %11 = tpu.matmul %8, %10, %cst_16 {dimension_numbers = #tpu.dot_dimension_numbers<[1], [0], [0], [1], [0, 0, 1, 1], [], []>} : vector<32x4xbf16>, vector<4x24xbf16>, vector<32x24xf32> -> vector<32x24xf32>
    %c0_17 = arith.constant 0 : index
    %c1 = arith.constant 1 : index
    %c0_18 = arith.constant 0 : index
    %12 = vector.load %arg4[%c0_17, %c1, %c0_18] : memref<2x24x24xbf16, #tpu.memory_space<vmem>>, vector<2x16x4xbf16>
    %13 = vector.shape_cast %12 : vector<2x16x4xbf16> to vector<32x4xbf16>
    %14 = vector.extract_strided_slice %5 {offsets = [1, 0, 0], sizes = [1, 4, 24], strides = [1, 1, 1]} : vector<5x4x24xbf16> to vector<1x4x24xbf16>
    %15 = vector.shape_cast %14 : vector<1x4x24xbf16> to vector<4x24xbf16>
    %cst_19 = arith.constant dense<0.000000e+00> : vector<32x24xf32>
    %16 = tpu.matmul %13, %15, %cst_19 {dimension_numbers = #tpu.dot_dimension_numbers<[1], [0], [0], [1], [0, 0, 1, 1], [], []>} : vector<32x4xbf16>, vector<4x24xbf16>, vector<32x24xf32> -> vector<32x24xf32>
    %17 = arith.addf %11, %16 : vector<32x24xf32>
    %c0_20 = arith.constant 0 : index
    %c2_21 = arith.constant 2 : index
    %c0_22 = arith.constant 0 : index
    %18 = vector.load %arg4[%c0_20, %c2_21, %c0_22] : memref<2x24x24xbf16, #tpu.memory_space<vmem>>, vector<2x16x4xbf16>
    %19 = vector.shape_cast %18 : vector<2x16x4xbf16> to vector<32x4xbf16>
    %20 = vector.extract_strided_slice %5 {offsets = [2, 0, 0], sizes = [1, 4, 24], strides = [1, 1, 1]} : vector<5x4x24xbf16> to vector<1x4x24xbf16>
    %21 = vector.shape_cast %20 : vector<1x4x24xbf16> to vector<4x24xbf16>
    %cst_23 = arith.constant dense<0.000000e+00> : vector<32x24xf32>
    %22 = tpu.matmul %19, %21, %cst_23 {dimension_numbers = #tpu.dot_dimension_numbers<[1], [0], [0], [1], [0, 0, 1, 1], [], []>} : vector<32x4xbf16>, vector<4x24xbf16>, vector<32x24xf32> -> vector<32x24xf32>
    %23 = arith.addf %17, %22 : vector<32x24xf32>
    %c0_24 = arith.constant 0 : index
    %c3 = arith.constant 3 : index
    %c0_25 = arith.constant 0 : index
    %24 = vector.load %arg4[%c0_24, %c3, %c0_25] : memref<2x24x24xbf16, #tpu.memory_space<vmem>>, vector<2x16x4xbf16>
    %25 = vector.shape_cast %24 : vector<2x16x4xbf16> to vector<32x4xbf16>
    %26 = vector.extract_strided_slice %5 {offsets = [3, 0, 0], sizes = [1, 4, 24], strides = [1, 1, 1]} : vector<5x4x24xbf16> to vector<1x4x24xbf16>
    %27 = vector.shape_cast %26 : vector<1x4x24xbf16> to vector<4x24xbf16>
    %cst_26 = arith.constant dense<0.000000e+00> : vector<32x24xf32>
    %28 = tpu.matmul %25, %27, %cst_26 {dimension_numbers = #tpu.dot_dimension_numbers<[1], [0], [0], [1], [0, 0, 1, 1], [], []>} : vector<32x4xbf16>, vector<4x24xbf16>, vector<32x24xf32> -> vector<32x24xf32>
    %29 = arith.addf %23, %28 : vector<32x24xf32>
    %c0_27 = arith.constant 0 : index
    %c4 = arith.constant 4 : index
    %c0_28 = arith.constant 0 : index
    %30 = vector.load %arg4[%c0_27, %c4, %c0_28] : memref<2x24x24xbf16, #tpu.memory_space<vmem>>, vector<2x16x4xbf16>
    %31 = vector.shape_cast %30 : vector<2x16x4xbf16> to vector<32x4xbf16>
    %32 = vector.extract_strided_slice %5 {offsets = [4, 0, 0], sizes = [1, 4, 24], strides = [1, 1, 1]} : vector<5x4x24xbf16> to vector<1x4x24xbf16>
    %33 = vector.shape_cast %32 : vector<1x4x24xbf16> to vector<4x24xbf16>
    %cst_29 = arith.constant dense<0.000000e+00> : vector<32x24xf32>
    %34 = tpu.matmul %31, %33, %cst_29 {dimension_numbers = #tpu.dot_dimension_numbers<[1], [0], [0], [1], [0, 0, 1, 1], [], []>} : vector<32x4xbf16>, vector<4x24xbf16>, vector<32x24xf32> -> vector<32x24xf32>
    %35 = arith.addf %29, %34 : vector<32x24xf32>
    %cst_30 = arith.constant dense<0.000000e+00> : vector<1x24xf32>
    %36 = tpu.matmul %0, %35, %cst_30 {dimension_numbers = #tpu.dot_dimension_numbers<[1], [0], [0], [1], [0, 0, 1, 1], [], []>} : vector<1x32xf32>, vector<32x24xf32>, vector<1x24xf32> -> vector<1x24xf32>
    %37 = arith.mulf %35, %35 : vector<32x24xf32>
    %cst_31 = arith.constant dense<0.000000e+00> : vector<1x24xf32>
    %38 = tpu.matmul %0, %37, %cst_31 {dimension_numbers = #tpu.dot_dimension_numbers<[1], [0], [0], [1], [0, 0, 1, 1], [], []>} : vector<1x32xf32>, vector<32x24xf32>, vector<1x24xf32> -> vector<1x24xf32>
    %cst_32 = arith.constant 3.125000e-02 : f32
    %39 = vector.broadcast %cst_32 : f32 to vector<1x24xf32>
    %40 = arith.mulf %36, %39 : vector<1x24xf32>
    %cst_33 = arith.constant 3.125000e-02 : f32
    %41 = vector.broadcast %cst_33 : f32 to vector<1x24xf32>
    %42 = arith.mulf %38, %41 : vector<1x24xf32>
    %43 = arith.mulf %40, %40 : vector<1x24xf32>
    %44 = arith.subf %42, %43 : vector<1x24xf32>
    %45 = vector.extract_strided_slice %6 {offsets = [0, 0], sizes = [1, 24], strides = [1, 1]} : vector<2x24xf32> to vector<1x24xf32>
    %cst_34 = arith.constant 9.99999974E-6 : f32
    %46 = vector.broadcast %cst_34 : f32 to vector<1x24xf32>
    %47 = arith.addf %44, %46 : vector<1x24xf32>
    %48 = math.rsqrt %47 : vector<1x24xf32>
    %49 = arith.mulf %45, %48 : vector<1x24xf32>
    %50 = vector.extract_strided_slice %6 {offsets = [1, 0], sizes = [1, 24], strides = [1, 1]} : vector<2x24xf32> to vector<1x24xf32>
    %51 = arith.mulf %40, %49 : vector<1x24xf32>
    %52 = arith.subf %50, %51 : vector<1x24xf32>
    %53 = vector.broadcast %49 : vector<1x24xf32> to vector<32x24xf32>
    %54 = arith.mulf %35, %53 : vector<32x24xf32>
    %55 = vector.broadcast %52 : vector<1x24xf32> to vector<32x24xf32>
    %56 = arith.addf %54, %55 : vector<32x24xf32>
    %cst_35 = arith.constant 0.000000e+00 : f32
    %57 = vector.broadcast %cst_35 : f32 to vector<32x24xf32>
    %58 = arith.maximumf %56, %57 : vector<32x24xf32>
    %cst_36 = arith.constant 0.000000e+00 : f32
    %59 = vector.broadcast %cst_36 : f32 to vector<32x128xf32>
    %c0_37 = arith.constant 0 : index
    %c0_38 = arith.constant 0 : index
    %60 = vector.load %arg3[%c0_37, %c0_38] : memref<32x128xf32, #tpu.memory_space<vmem>>, vector<32x128xf32>
    tpu.vector_store %arg3[%c0_37, %c0_38], %59 {strides = array<i32>} : memref<32x128xf32, #tpu.memory_space<vmem>>, vector<32x128xf32>,
    %c0_39 = arith.constant 0 : index
    %c0_40 = arith.constant 0 : index
    %61 = vector.load %arg3[%c0_39, %c0_40] : memref<32x128xf32, #tpu.memory_space<vmem>>, vector<32x24xf32>
    tpu.vector_store %arg3[%c0_39, %c0_40], %58 {strides = array<i32>} : memref<32x128xf32, #tpu.memory_space<vmem>>, vector<32x24xf32>,
    return
  }
}

</mosaic_0001>

<bundles_post_ra>
// kernel: tpu_custom_call.1
= control target key start
LH: loop header
LB: loop body
LE: loop exit
PB: predicated region body
PF: predicated region fallthrough
CT: control target
= control target key end

     0   :  { %vm135_vm0 = vcmask 1041408   ;;  %vm16_vm1 = vcmask 191488   ;;  %vm31_vm2 = vcmask 1040384   ;;  %v934_v2 = vmov 0   ;;  %s1133_s0 = inlined_call_operand.vmem [shape: bf16[2,16,4], index: 0, kind: input, shape index: {}]   ;;  %s1134_s1 = inlined_call_operand.vmem [shape: bf16[5,4,24], index: 1, kind: input, shape index: {}]   ;;  %s1135_s2 = inlined_call_operand.vmem [shape: f32[2,24], index: 2, kind: input, shape index: {}]   ;;  %s1136_s3 = inlined_call_operand.hbm [shape: f32[32,128], index: 3, kind: output, shape index: {}]  }
   0x1   :  { %v61_v0 = vld [vmem:[%s1134_s1 + $0x4] sm:$0x3]  ;;  %17 = vst.msk [vmem:[#allocation2] sm:$0xf] %vm16_vm1, %v934_v2  ;;  %18 = vst.msk [vmem:[#allocation2 + $0x4] sm:$0xf] %vm16_vm1, %v934_v2 }
   0x2   :  { %895 = vmatprep.subr.msk.bf16.mxu0 %vm135_vm0, %v61_v0  ;;  %v292_v1 = vsel %vm135_vm0, %v61_v0, 0  ;;  %19 = vst.msk [vmem:[#allocation2 + $0x8] sm:$0xf] %vm16_vm1, %v934_v2  ;;  %20 = vst.msk [vmem:[#allocation2 + $0xc] sm:$0xf] %vm16_vm1, %v934_v2  ;;  %vm32_vm3 = vcmask 1044484  }
   0x3   :  { %21 = vst.msk [vmem:[#allocation2 + $0x10] sm:$0xf] %vm16_vm1, %v934_v2  ;;  %22 = vst.msk [vmem:[#allocation2 + $0x14] sm:$0xf] %vm16_vm1, %v934_v2  ;;  %v23_v3 = vld [vmem:[%s1133_s0] sm:$0xf]  ;;  %826 = vmatpush3.bf16.msra.mxu0 %v292_v1 }
   0x4   :  { %v24_v4 = vld [vmem:[%s1133_s0 + $0x4] sm:$0xf]  ;;  %v25_v5 = vld [vmem:[%s1133_s0 + $0x8] sm:$0xf]  ;;  %v26_v6 = vld [vmem:[%s1133_s0 + $0xc] sm:$0xf] }
   0x5   :  { %v34_v7 = vrot.slane %v23_v3, 7  ;;  %v36_v8 = vrot.slane %v24_v4, 7  ;;  %vm980_vm4 = vmor %vm31_vm2, %vm32_vm3  ;;  %v39_v10 = vrot.slane %v25_v5, 7  ;;  %v41_v11 = vrot.slane %v26_v6, 7  ;;  %v62_v12 = vld [vmem:[%s1134_s1 + $0x6] sm:$0x3] }
   0x6   :  { %vm50_vm5 = vcmask 27649   ;;  %vm52_vm6 = vcmask 27648   ;;  %vm54_vm7 = vcmask 24576   ;;  %896 = vmatprep.subr.msk.bf16.mxu0 %vm135_vm0, %v62_v12  ;;  %v60_v15 = vld [vmem:[%s1134_s1 + $0x2] sm:$0x3]  ;;  %vm262_vm8 = vcmask 1042432  }
   0x7   :  { %v35_v13 = vrot.slane %v34_v7, 4  ;;  %v38_v14 = vrot.slane %v36_v8, 4  ;;  %51 = vst.msk [vmem:[#allocation2] sm:$0xe] %vm50_vm5, %v34_v7  ;;  %v40_v16 = vrot.slane %v39_v10, 4  ;;  %v43_v17 = vrot.slane %v41_v11, 4  ;;  %893 = vmatprep.subr.msk.bf16.mxu1 %vm135_vm0, %v60_v15 }
   0x8   :  { %56 = vst.msk [vmem:[#allocation2 + $0xc] sm:$0xe] %vm50_vm5, %v39_v10  ;;  %v59_v18 = vld [vmem:[%s1134_s1] sm:$0x3]  ;;  %v137_v20 = vsel %vm135_vm0, %v60_v15, 0  ;;  %vm263_vm9 = vcmask 1046532  }
   0x9   :  { %v37_v19 = vsel %vm980_vm4, %v35_v13, %v36_v8  ;;  %55 = vst.msk [vmem:[#allocation2 + $0x8] sm:$0x1] %vm54_vm7, %v38_v14  ;;  %v42_v21 = vsel %vm980_vm4, %v40_v16, %v41_v11  ;;  %58 = vst.msk [vmem:[#allocation2 + $0x14] sm:$0x1] %vm54_vm7, %v43_v17  ;;  %814 = vmatpush3.bf16.msra.mxu1 %v137_v20  ;;  %vm71_vm10 = vsmask.f32 3328 }
   0xa   :  { %53 = vst.msk [vmem:[#allocation2 + $0x4] sm:$0xf] %vm52_vm6, %v37_v19  ;;  %57 = vst.msk [vmem:[#allocation2 + $0x10] sm:$0xf] %vm52_vm6, %v42_v21  ;;  %894 = vmatprep.subr.msk.bf16.mxu1 %vm135_vm0, %v59_v18  ;;  %vm72_vm11 = vsmask.f32 7440 }
   0xb   :  { %vm128_vm12 = vcmask 31744   ;;  %v1004_v23 = vsel %vm135_vm0, %v62_v12, 0  ;;  %v1009_v25 = vsel %vm135_vm0, %v59_v18, 0  ;;  %vm1017_vm13 = vmor %vm262_vm8, %vm263_vm9  ;;  %vm349_vm14 = vsmask.f32 2304 }
   0xc   :  { %vm350_vm15 = vsmask.f32 6416  ;;  %vm1037_vm1 = vmor %vm71_vm10, %vm72_vm11 }
   0xe   :  { %v256_v22 = vld [vmem:[#allocation2] sm:$0xe] }
   0xf   :  { %v1006_v24 = vld [vmem:[#allocation2] sm:$0xf]  ;;  %v770_v26 = vrot.slane %v256_v22, 9  ;;  %v353_v27 = vshrl.u32 %v256_v22, 16  ;;  %v356_v28 = vshll.u32 %v256_v22, 16 }
  0x10   :  { %v257_v29 = vld [vmem:[#allocation2 + $0xc] sm:$0xe]  ;;  %v75_v30 = vshrl.u32 %v1006_v24, 16  ;;  %v69_v31 = vld [vmem:[#allocation2 + $0x8] sm:$0x1]  ;;  %v78_v35 = vshll.u32 %v1006_v24, 16 }
  0x11   :  { %v771_v32 = vrot.slane %v257_v29, 9  ;;  %v376_v33 = vshrl.u32 %v257_v29, 16  ;;  %v379_v34 = vshll.u32 %v257_v29, 16  ;;  %v1013_v36 = vld [vmem:[#allocation2 + $0x4] sm:$0xf]  ;;  %v270_v38 = vrot.slane %v69_v31, 5 }
  0x12   :  { %v355_v39 = vrot.slane %v353_v27, 5  ;;  %v358_v40 = vrot.slane %v356_v28, 6  ;;  %v77_v41 = vrot.slane %v75_v30, 4  ;;  %v267_v42 = vrot.slane %v1013_v36, 5  ;;  %v1022_v43 = vld [vmem:[#allocation2 + $0x10] sm:$0xf] }
  0x13   :  { %v70_v44 = vld [vmem:[#allocation2 + $0x14] sm:$0x1]  ;;  %v1024_v45 = vrot.slane %v376_v33, 5  ;;  %v274_v46 = vrot.slane %v1022_v43, 5  ;;  %v1027_v48 = vrot.slane %v379_v34, 6  ;;  %v80_v49 = vrot.slane %v78_v35, 5 }
  0x14   :  { %v277_v47 = vrot.slane %v70_v44, 5  ;;  %v268_v50 = vsel %vm1017_vm13, %v770_v26, %v267_v42  ;;  %v269_v51 = vrot.slane %v267_v42, 4  ;;  %v84_v52 = vshll.u32 %v1013_v36, 16  ;;  %v1041_v59 = vld [vmem:[#allocation2 + $0xc] sm:$0xf] }
  0x15   :  { %v88_v53 = vshrl.u32 %v1013_v36, 16  ;;  %v275_v54 = vsel %vm1017_vm13, %v771_v32, %v274_v46  ;;  %v276_v55 = vrot.slane %v274_v46, 4  ;;  %v81_v57 = vor.u32 %v80_v49, %v77_v41 }
  0x16   :  { %v94_v58 = vshll.u32 %v69_v31, 16  ;;  %v271_v60 = vsel %vm1017_vm13, %v269_v51, %v270_v38  ;;  %v86_v61 = vrot.slane %v84_v52, 5 }
  0x17   :  { %v90_v62 = vrot.slane %v88_v53, 4  ;;  %v361_v63 = vrot.slane %v88_v53, 5 }
  0x18   :  { %8 = vsyncpa [#allocation4], 0  ;;  %v772_v0 = vcombine.low %v268_v50, %v271_v60  ;;  %v278_v1 = vsel %vm1017_vm13, %v276_v55, %v277_v47  ;;  %v82_v2 = vrot.slane %v81_v57, 4  ;;  %v96_v3 = vrot.slane %v94_v58, 5  ;;  %v1057_v12 = vld [vmem:[%s1134_s1 + $0x8] sm:$0x3] }
  0x19   :  { %vm473_vm2 = vcmask 1045508   ;;  %v773_v4 = vcombine.low %v275_v54, %v278_v1  ;;  %v91_v5 = vor.u32 %v90_v62, %v86_v61  ;;  %v362_v6 = vrot.slane %v84_v52, 6  ;;  %v347_v16 = vld [vmem:[#allocation2 + $0x8] sm:$0x3]  ;;  %v348_v33 = vld [vmem:[#allocation2 + $0x14] sm:$0x3]  ;;  %vm1067_vm3 = vmor %vm349_vm14, %vm350_vm15 }
  0x1a   :  { %v99_v7 = vshrl.u32 %v1041_v59, 16  ;;  %827 = vmatprep.mubr.msk.bf16.mxu0 %vm128_vm12, %v772_v0  ;;  %v87_v8 = vsel %vm1037_vm1, %v82_v2, %v86_v61  ;;  %v102_v9 = vshll.u32 %v1041_v59, 16  ;;  %v108_v10 = vshll.u32 %v1022_v43, 16  ;;  %v466_v50 = vld [vmem:[#allocation2] sm:$0xc]  ;;  %vm1084_vm4 = vmor %vm135_vm0, %vm473_vm2  ;;  %s939_s30 = smov [#allocation3]  }
  0x1b   :  { %v112_v11 = vshrl.u32 %v1022_v43, 16  ;;  %828 = vmatmul.mubr.msk.bf16.vlgmr.msra.gmra.mrb[0].mxu0 %vm128_vm12, %v773_v4  ;;  %v92_v13 = vrot.slane %v91_v5, 4  ;;  %v118_v15 = vshll.u32 %v70_v44, 16  ;;  %v359_v17 = vor.u32 %v358_v40, %v355_v39  ;;  %s751_s4 = sshll.u32 %s939_s30, 4  ;;  %s752_s4 = int_to_ptr.vmem [resolvable:$true] %s751_s4 }
  0x1c   :  { %v101_v14 = vrot.slane %v99_v7, 4  ;;  %832 = vmatpush3.bf16.msra.mxu0 %v1004_v23  ;;  %v104_v18 = vrot.slane %v102_v9, 5  ;;  %v110_v19 = vrot.slane %v108_v10, 5  ;;  %v385_v21 = vrot.slane %v108_v10, 6  ;;  %v467_v7 = vld [vmem:[#allocation2 + $0xc] sm:$0xc]  ;;  %p915_p1 = scmp.lt.s32.totalorder %s752_s4, %s752_s4 }
  0x1d   :  { %v114_v20 = vrot.slane %v112_v11, 4  ;;  %v97_v22 = vsel %vm1037_vm1, %v92_v13, %v96_v3  ;;  %v120_v26 = vrot.slane %v118_v15, 5  ;;  %v360_v27 = vrot.slane %v359_v17, 4  ;;  %897 = vmatprep.subr.msk.bf16.mxu0 %vm135_vm0, %v1057_v12 }
  0x1e   :  { %v363_v28 = vor.u32 %v362_v6, %v361_v63  ;;  %v762_v29 = vcombine.low %v87_v8, %v97_v22  ;;  %v105_v30 = vor.u32 %v104_v18, %v101_v14  ;;  %v367_v32 = vshrl.u32 %v347_v16, 16 }
  0x1f   :  { %v115_v31 = vor.u32 %v114_v20, %v110_v19  ;;  %v370_v35 = vshll.u32 %v347_v16, 16  ;;  %v382_v37 = vor.u32 %v1027_v48, %v1024_v45  ;;  %v766_v38 = vcombine.low %v1006_v24, %v1013_v36 }
  0x20   :  { %v365_v34 = vrot.slane %v363_v28, 4  ;;  %815 = vmatprep.mubr.msk.bf16.mxu1 %vm128_vm12, %v762_v29  ;;  %v106_v39 = vrot.slane %v105_v30, 4  ;;  %v369_v41 = vrot.slane %v367_v32, 5  ;;  %v384_v42 = vrot.slane %v112_v11, 5 }
  0x21   :  { %v116_v40 = vrot.slane %v115_v31, 4  ;;  %v372_v44 = vrot.slane %v370_v35, 6  ;;  %v383_v46 = vrot.slane %v382_v37, 4  ;;  %v390_v47 = vshrl.u32 %v348_v33, 16 }
  0x22   :  { %v393_v49 = vshll.u32 %v348_v33, 16  ;;  %v111_v51 = vsel %vm1037_vm1, %v106_v39, %v110_v19  ;;  %v364_v24 = vsel %vm1067_vm3, %v360_v27, %v363_v28  ;;  %v386_v48 = vor.u32 %v385_v21, %v384_v42 }
  0x23   :  { %v121_v45 = vsel %vm1037_vm1, %v116_v40, %v120_v26  ;;  %v373_v53 = vor.u32 %v372_v44, %v369_v41  ;;  %v392_v54 = vrot.slane %v390_v47, 5  ;;  %v780_v60 = vrot.slane %v466_v50, 10 }
  0x24   :  { %v763_v52 = vcombine.low %v111_v51, %v121_v45  ;;  %v395_v55 = vrot.slane %v393_v49, 6  ;;  %v388_v58 = vrot.slane %v386_v48, 4  ;;  %v477_v61 = vrot.slane %v1013_v36, 6 }
  0x25   :  { %v374_v56 = vsel %vm1067_vm3, %v365_v34, %v373_v53  ;;  %v387_v62 = vsel %vm1067_vm3, %v383_v46, %v386_v48  ;;  %v480_v0 = vrot.slane %v347_v16, 6  ;;  %v484_v4 = vrot.slane %v1022_v43, 6  ;;  %v64_v48 = vld [vmem:[%s1135_s2] sm:$0x3]  ;;  %s910_s2 = scalar_lea.vmem %s752_s4, 512 }
  0x26   :  { %816 = vmatmul.mubr.msk.bf16.vlgmr.msra.gmra.mrb[0].mxu1 %vm128_vm12, %v763_v52  ;;  %v396_v63 = vor.u32 %v395_v55, %v392_v54  ;;  %v776_v1 = vcombine.low %v364_v24, %v374_v56  ;;  %v478_v2 = vsel %vm1084_vm4, %v780_v60, %v477_v61  ;;  %v479_v3 = vrot.slane %v477_v61, 4  ;;  %p911_p0 = scmp.ne.s32.totalorder %s752_s4, %s910_s2  ;;  %p916_p2 = scmp.lt.s32.totalorder %s910_s2, %s910_s2 }
  0x27   :  { %820 = vmatpush3.bf16.msra.mxu1 %v1009_v25  ;;  %821 = vmatprep.mubr.msk.bf16.mxu1 %vm128_vm12, %v766_v38  ;;  %v502_v6 = vsel %vm135_vm0, %v1057_v12, 0  ;;  %v781_v9 = vrot.slane %v467_v7, 10  ;;  %v486_v10 = vrot.slane %v484_v4, 4  ;;  %v487_v11 = vrot.slane %v348_v33, 6 }
  0x28   :  { %v397_v36 = vsel %vm1067_vm3, %v388_v58, %v396_v63  ;;  %833 = vmatprep.mubr.msk.bf16.mxu0 %vm128_vm12, %v776_v1  ;;  %v481_v25 = vsel %vm1084_vm4, %v479_v3, %v480_v0  ;;  %v767_v13 = vcombine.low %v1041_v59, %v1022_v43  ;;  %v935_v16 = vmov 0.0|0.0   ;;  %p917_p3 = por %p916_p2, %p915_p1 }
  0x29   :  { %v777_v5 = vcombine.low %v387_v62, %v397_v36  ;;  %v782_v8 = vcombine.low %v478_v2, %v481_v25  ;;  %v485_v14 = vsel %vm1084_vm4, %v781_v9, %v484_v4  ;;  %v488_v12 = vsel %vm1084_vm4, %v486_v10, %v487_v11  ;;  %865 = vmatprep.subr.bf16.mxu1 %v935_v16 }
  0x2a   :  { %v783_v15 = vcombine.low %v485_v14, %v488_v12  ;;  %vm936_vm0 = vmmov 0   ;;  %v937_v17 = vmov 0.0   ;;  %vm557_vm5 = vcmask 261120   ;;  %p918_p4 = pnand %p917_p3, %p911_p0 }
  0x2b   :  { %834 = vmatmul.mubr.msk.bf16.vlgmr.msra.gmra.mrb[0].mxu0 %vm128_vm12, %v777_v5  ;;  %737 = vst [vmem:[#allocation3] sm:$0xff] %v937_v17  ;;  %738 = vst [vmem:[#allocation3 + $0x8] sm:$0xff] %v937_v17  ;;  %v938_v37 = vmov 1.0   ;;  %v717_v45 = vlaneseq  ;;  %vm741_vm6 = vcmask 195584  }
  0x2c   :  { %838 = vmatpush3.bf16.msra.mxu0 %v502_v6  ;;  %839 = vmatprep.mubr.msk.bf16.mxu0 %vm128_vm12, %v782_v8  ;;  %739 = vst [vmem:[#allocation3 + $0x10] sm:$0xff] %v937_v17  ;;  %740 = vst [vmem:[#allocation3 + $0x18] sm:$0xff] %v937_v17 }
  0x2d   :  { %v718_v24 = vshrl.u32 %v717_v45, 7 }
  0x2f   :  { %v719_v53 = vsub.s32 0, %v718_v24  ;;  %v727_v60 = vsub.s32 1, %v718_v24 }
  0x32   :  { %822 = vmatmul.mubr.msk.bf16.vlgmr.msra.gmra.mrb[0].mxu1 %vm128_vm12, %v767_v13 }
  0x33   :  { %851 = vmatprep.mubr.msk.f32.mxu1 %vm936_vm0, %v937_v17 }
  0x37   :  { %840 = vmatmul.mubr.msk.bf16.vlgmr.msra.gmra.mrb[0].mxu0 %vm128_vm12, %v783_v15 }
 0x105   :  { %v823_v43 = vpop.f32.mrb[0].mxu1 }
 0x106   :  { %v241_v59 = vpop.f32.mrb[1].mxu1 }
 0x107   :  { %v824_v18 = vpop.f32.mrb[2].mxu1 }
 0x108   :  { %v244_v19 = vpop.f32.mrb[3].mxu1 }
 0x10a   :  { %v841_v20 = vpop.f32.mrb[0].mxu0 }
 0x10b   :  { %v877_v21 = vadd.f32 %v841_v20, %v823_v43  ;;  %v538_v22 = vpop.f32.mrb[1].mxu0 }
 0x10c   :  { %v878_v26 = vadd.f32 %v538_v22, %v241_v59  ;;  %v842_v27 = vpop.f32.mrb[2].mxu0 }
 0x10d   :  { %v879_v28 = vadd.f32 %v842_v27, %v824_v18  ;;  %v541_v29 = vpop.f32.mrb[3].mxu0  ;;  %v633_v38 = vmul.f32 %v877_v21, %v877_v21 }
 0x10e   :  { %v880_v30 = vadd.f32 %v541_v29, %v244_v19  ;;  %v631_v23 = vmul.f32 %v878_v26, %v878_v26 }
 0x10f   :  { %v869_v32 = vpack.c.bf16 %v879_v28, %v877_v21  ;;  %v634_v34 = vmul.f32 %v879_v28, %v879_v28 }
 0x110   :  { %v866_v31 = vpack.c.bf16 %v880_v30, %v878_v26  ;;  %v632_v33 = vmul.f32 %v880_v30, %v880_v30 }
 0x111   :  { %v875_v39 = vpack.c.bf16 %v634_v34, %v633_v38 }
 0x112   :  { %867 = vmatpush3.bf16.msra.mxu1 %v866_v31  ;;  %v872_v35 = vpack.c.bf16 %v632_v33, %v631_v23 }
 0x113   :  { %868 = vmatprep.subr.bf16.mxu1 %v935_v16 }
 0x116   :  { %870 = vmatpush3.bf16.msra.mxu1 %v869_v32 }
 0x117   :  { %871 = vmatprep.subr.bf16.mxu1 %v935_v16 }
 0x119   :  { %852 = vmatmul.mubr.msk.f32.vlgmr.msra.gmra.mrb[4].mxu1 %vm557_vm5, %v938_v37 }
 0x11a   :  { %873 = vmatpush3.bf16.msra.mxu1 %v872_v35  ;;  %862 = vmatprep.mubr.msk.f32.mxu1 %vm936_vm0, %v937_v17 }
 0x11b   :  { %874 = vmatprep.subr.bf16.mxu1 %v935_v16 }
 0x11e   :  { %876 = vmatpush3.bf16.msra.mxu1 %v875_v39 }
 0x121   :  { %863 = vmatmul.mubr.msk.f32.vlgmr.msra.gmra.mrb[6].mxu1 %vm557_vm5, %v938_v37 }
 0x1ec   :  { %v627_v40 = vpop.f32.mrb[4].mxu1 }
 0x1ed   :  { %v853_v41 = vpop.f32.mrb[5].mxu1  ;;  %v705_v42 = vmul.f32 0.03125, %v627_v40 }
 0x1ef   :  { %v707_v46 = vmul.f32 %v705_v42, %v705_v42 }
 0x1f4   :  { %v701_v44 = vpop.f32.mrb[6].mxu1 }
 0x1f5   :  { %v706_v47 = vmul.f32 0.03125, %v701_v44  ;;  %v864_v49 = vpop.f32.mrb[7].mxu1 }
 0x1f7   :  { %v708_v50 = vsub.f32 %v706_v47, %v707_v46 }
 0x1f9   :  { %v709_v51 = vadd.f32 1e-05, %v708_v50 }
 0x1fb   :  { %908 = vrsqrt.f32 %v709_v51 }
 0x205   :  { %v909_v52 = vpop.eup %908 }
 0x206   :  { %v711_v54 = vmul.f32 %v909_v52, %v64_v48 }
 0x208   :  { %v712_v55 = vmul.f32 %v711_v54, %v705_v42  ;;  %v720_v57 = vrot.slane %v711_v54, %v719_v53 }
 0x20a   :  { %v714_v58 = vrot.slane %v712_v55, 7  ;;  %v721_v56 = vmul.f32 %v878_v26, %v720_v57  ;;  %v722_v63 = vmul.f32 %v880_v30, %v720_v57  ;;  %v723_v0 = vmul.f32 %v877_v21, %v720_v57 }
 0x20b   :  { %v724_v1 = vmul.f32 %v879_v28, %v720_v57 }
 0x20c   :  { %v716_v61 = vsub.f32 %v64_v48, %v714_v58 }
 0x20e   :  { %v728_v62 = vrot.slane %v716_v61, %v727_v60 }
 0x210   :  { %v729_v2 = vadd.f32 %v728_v62, %v721_v56  ;;  %v730_v3 = vadd.f32 %v728_v62, %v722_v63  ;;  %v731_v36 = vadd.f32 %v728_v62, %v723_v0  ;;  %v732_v4 = vadd.f32 %v728_v62, %v724_v1 }
 0x212   :  { %v733_v5 = vmax.f32 %v729_v2, 0.0  ;;  %v734_v6 = vmax.f32 %v730_v3, 0.0  ;;  %v735_v25 = vmax.f32 %v731_v36, 0.0  ;;  %v736_v7 = vmax.f32 %v732_v4, 0.0 }
 0x214   :  { %742 = vst.msk [vmem:[#allocation3] sm:$0xff] %vm741_vm6, %v733_v5  ;;  %743 = vst.msk [vmem:[#allocation3 + $0x8] sm:$0xff] %vm741_vm6, %v734_v6 }
 0x215   :  { %744 = vst.msk [vmem:[#allocation3 + $0x10] sm:$0xff] %vm741_vm6, %v735_v25  ;;  %745 = vst.msk [vmem:[#allocation3 + $0x18] sm:$0xff] %vm741_vm6, %v736_v7 }
 0x216   :  { %921 = shalt.err (!%p918_p4)
}
 0x217   :  { %s922_s7 = scalar_lea.hbm %s1136_s3, 512 }
 0x218   :  { %p923_p5 = scmp.ne.s32.totalorder %s1136_s3, %s922_s7  ;;  %p926_p6 = scmp.lt.u32.totalorder %s922_s7, %s1136_s3 }
 0x21a   :  { %p928_p7 = pnand %p926_p6, %p923_p5 }
 0x21c   :  { %931 = shalt.err (!%p928_p7)
}
 0x21d   :  { %s940_s12 = smov 128   ;;  %s941_s13 = smov 8  }
 0x21e   :  { %757 = dma.vmem_to_hbm [thread:$0]  %s752_s4, 512, %s1136_s3, [#allocation4], %s940_s12, %s940_s12, %s941_s13  }
 0x21f   :  { %932 = dma.done.wait [#allocation4], 512  }
 0x220   :  { %933 = vsyncadd [#allocation4], 4294966784 }
 0x221   :  { %761 = vsyncpa [#allocation4], 1 }

</bundles_post_ra>
